<compile_context>
chip_gen: v7x
topology: tpu7x:2x2x1
jax: 0.10.0
libtpu: 0.0.40
codegen_flags: <defaults>
</compile_context>

<pallas_src>
import functools

import jax
import jax.numpy as jnp
from jax import lax
from jax.experimental import pallas as pl
from jax.experimental.pallas import tpu as pltpu


def _banded_conv_matrix(w, width):
    """Fold a 3x3 'same'-padded conv along x into a single matmul RHS.

    w     : (3, 3, Cin, Cout) HWIO weights (BN scale already folded in).
    width : spatial width W.
    Returns (3*W*Cin, W*Cout) with
        M[ky*W*Cin + xs*Cin + ci, x*Cout + co] = w[ky, xs - x + 1, ci, co]
    when |xs - x| <= 1, else 0 (the zero band implements the x padding).
    """
    kh, kw, cin, cout = w.shape
    big = jnp.zeros((kh, width, cin, width, cout), w.dtype)
    for xo in range(width):
        lo, hi = max(0, xo - 1), min(width, xo + 2)
        big = big.at[:, lo:hi, :, xo, :].set(w[:, lo - xo + 1:hi - xo + 1, :, :])
    return big.reshape(kh * width * cin, width * cout)


def basic_block_kernel(x_ref, w1_ref, b1_ref, w2_ref, b2_ref, out_ref):
    """Fused conv3x3 -> BN -> ReLU -> conv3x3 -> BN -> (+identity) -> ReLU.

    Per grid step (one image), packed layout (channels fastest inside a row):
      x_ref  : (H, W*Cin)          f32 input (also the identity shortcut)
      w1_ref : (3*W*Cin, W*Cout)   bf16 banded conv1 weights (BN1 scale folded)
      b1_ref : (1, W*Cout)         f32 folded BN1 bias, tiled over W
      w2_ref : (3*W*Cout, W*Cout)  bf16 banded conv2 weights (BN2 scale folded)
      b2_ref : (1, W*Cout)         f32 folded BN2 bias, tiled over W
      out_ref: (H, W*Cout)         f32 output
    """
    x = x_ref[...]                                            # (H, W*C) f32

    def shifted_rows(a):
        """[row y-1 | row y | row y+1] concatenated along lanes; zero rows at
        the top/bottom border implement the y-direction 'same' padding."""
        zero = jnp.zeros((1, a.shape[1]), a.dtype)
        up = jnp.concatenate([zero, a[:-1, :]], axis=0)       # row y -> a[y-1]
        dn = jnp.concatenate([a[1:, :], zero], axis=0)        # row y -> a[y+1]
        return jnp.concatenate([up, a, dn], axis=1)           # (H, 3*W*C)

    # ---- conv1 (+ folded BN1) as one MXU matmul, bias + ReLU ----
    lhs1 = shifted_rows(x).astype(jnp.bfloat16)
    y1 = jnp.dot(lhs1, w1_ref[...], preferred_element_type=jnp.float32)
    y1 = jnp.maximum(y1 + b1_ref[...], 0.0)                   # (H, W*Cout) f32

    # ---- conv2 (+ folded BN2) as one MXU matmul, bias + identity + ReLU ----
    lhs2 = shifted_rows(y1).astype(jnp.bfloat16)
    y2 = jnp.dot(lhs2, w2_ref[...], preferred_element_type=jnp.float32)
    out_ref[...] = jnp.maximum(y2 + b2_ref[...] + x, 0.0).astype(out_ref.dtype)


def basic_block_forward(x_nchw, params):
    """Wrapper: NCHW in / NCHW out. Grid over batch, one image per step."""
    w1, s1, b1 = params["w1"], params["s1"], params["b1"]
    w2, s2, b2 = params["w2"], params["s2"], params["b2"]

    N, Cin, H, W = x_nchw.shape
    Cout = w1.shape[-1]
    assert Cin == Cout, "identity shortcut requires in_planes == planes"
    # TODO(synk): projection shortcut (stride != 1 or in_planes != planes) not covered.

    # Packed lane-dense activation layout: (N, H, W*Cin), channels fastest.
    x = jnp.transpose(x_nchw, (0, 2, 3, 1)).reshape(N, H, W * Cin)

    # Host-side precompute: fold BN scales into weights, build banded matmul
    # weights (bf16 for the MXU), tile biases over W to match the packed layout.
    w1b = _banded_conv_matrix(w1 * s1[None, None, None, :], W).astype(jnp.bfloat16)
    w2b = _banded_conv_matrix(w2 * s2[None, None, None, :], W).astype(jnp.bfloat16)
    b1p = jnp.tile(b1, W).reshape(1, W * Cout).astype(jnp.float32)
    b2p = jnp.tile(b2, W).reshape(1, W * Cout).astype(jnp.float32)

    # Advisory cost estimate and a VMEM budget sized from the actual tiles
    # (+ headroom), capped well below v7x's 64 MiB per-core VMEM.
    flops = 2 * N * H * (3 * W * Cin) * (W * Cout) \
        + 2 * N * H * (3 * W * Cout) * (W * Cout)
    bytes_accessed = (x.size * 4 + N * H * W * Cout * 4
                      + (w1b.size + w2b.size) * 2 + (b1p.size + b2p.size) * 4)
    blk_bytes = 2 * H * W * (Cin + Cout) * 4                 # in/out, double-buffered
    wt_bytes = 2 * ((w1b.size + w2b.size) * 2 + (b1p.size + b2p.size) * 4)
    tmp_bytes = 4 * H * 3 * W * max(Cin, Cout) * 6           # LHS builds (f32 + bf16)
    vmem_limit = int(min(blk_bytes + wt_bytes + tmp_bytes + (8 << 20), 48 << 20))

    out = pl.pallas_call(
        basic_block_kernel,
        out_shape=jax.ShapeDtypeStruct((N, H, W * Cout), jnp.float32),
        grid=(N,),
        in_specs=[
            pl.BlockSpec((None, H, W * Cin), lambda n: (n, 0, 0)),           # x
            pl.BlockSpec((3 * W * Cin, W * Cout), lambda n: (0, 0)),         # w1 banded
            pl.BlockSpec((1, W * Cout), lambda n: (0, 0)),                   # b1
            pl.BlockSpec((3 * W * Cout, W * Cout), lambda n: (0, 0)),        # w2 banded
            pl.BlockSpec((1, W * Cout), lambda n: (0, 0)),                   # b2
        ],
        out_specs=pl.BlockSpec((None, H, W * Cout), lambda n: (n, 0, 0)),
        compiler_params=pltpu.CompilerParams(
            dimension_semantics=("parallel",),
            vmem_limit_bytes=vmem_limit),
        cost_estimate=pl.CostEstimate(flops=int(flops), transcendentals=0,
                                      bytes_accessed=int(bytes_accessed)),
    )(x, w1b, b1p, w2b, b2p)

    return jnp.transpose(out.reshape(N, H, W, Cout), (0, 3, 1, 2))           # NCHW


def make_params(key, in_planes, planes):
    """Deterministic parameter init matching BasicBlock.__init__ shapes (eval-mode BN)."""
    k1, k2, k3, k4, k5, k6 = jax.random.split(key, 6)
    # Conv weights: PyTorch layout (Cout, Cin, 3, 3) -> HWIO.
    w1_oihw = jax.random.normal(k1, (planes, in_planes, 3, 3), jnp.float32) * 0.1
    w2_oihw = jax.random.normal(k2, (planes, planes, 3, 3), jnp.float32) * 0.1
    w1 = jnp.transpose(w1_oihw, (2, 3, 1, 0))
    w2 = jnp.transpose(w2_oihw, (2, 3, 1, 0))

    # BatchNorm2d (eval mode): running stats at init values.
    eps = 1e-5
    gamma1 = 1.0 + 0.1 * jax.random.normal(k3, (planes,), jnp.float32)
    beta1 = 0.1 * jax.random.normal(k4, (planes,), jnp.float32)
    gamma2 = 1.0 + 0.1 * jax.random.normal(k5, (planes,), jnp.float32)
    beta2 = 0.1 * jax.random.normal(k6, (planes,), jnp.float32)
    mean = jnp.zeros((planes,), jnp.float32)
    var = jnp.ones((planes,), jnp.float32)

    s1 = gamma1 / jnp.sqrt(var + eps)
    b1 = beta1 - mean * s1
    s2 = gamma2 / jnp.sqrt(var + eps)
    b2 = beta2 - mean * s2
    return {"w1": w1, "s1": s1, "b1": b1, "w2": w2, "s2": s2, "b2": b2}


def reference_forward(x_nchw, params):
    """Pure-JAX f32 reference of the same forward (for numerical check)."""
    x = jnp.transpose(x_nchw, (0, 2, 3, 1))
    dn = ("NHWC", "HWIO", "NHWC")
    y = lax.conv_general_dilated(x, params["w1"], (1, 1), "SAME",
                                 dimension_numbers=dn)
    y = jnp.maximum(y * params["s1"] + params["b1"], 0.0)
    z = lax.conv_general_dilated(y, params["w2"], (1, 1), "SAME",
                                 dimension_numbers=dn)
    z = z * params["s2"] + params["b2"] + x
    return jnp.transpose(jnp.maximum(z, 0.0), (0, 3, 1, 2))


if __name__ == "__main__":
    key = jax.random.PRNGKey(0)
    kx, kp = jax.random.split(key)

    N, C, H, W = 2, 4, 16, 16          # batch=2, in_planes=planes=4, spatial=16
    x = jax.random.normal(kx, (N, C, H, W), jnp.float32)
    params = make_params(kp, in_planes=C, planes=C)

    fwd = jax.jit(functools.partial(basic_block_forward, params=params))
    out = fwd(x)
    jax.block_until_ready(out)

    ref = reference_forward(x, params)
    assert out.shape == (N, C, H, W)
    # Kernel uses bf16 MXU operands with BN scale pre-folded into the weights
    # (f32 accumulation); tolerance covers the bf16 rounding of conv operands.
    assert jnp.allclose(out, ref, atol=3e-2, rtol=3e-2), "mismatch vs JAX reference"

    print("KERNEL_OK")
</pallas_src>

<mosaic_0001>
module attributes {stable_mosaic.version = 11 : i64} {
  func.func @basic_block_kernel(%arg0: i32, %arg1: memref<1x16x64xf32, #tpu.memory_space<vmem>>, %arg2: memref<192x64xbf16, #tpu.memory_space<vmem>>, %arg3: memref<1x64xf32, #tpu.memory_space<vmem>>, %arg4: memref<192x64xbf16, #tpu.memory_space<vmem>>, %arg5: memref<1x64xf32, #tpu.memory_space<vmem>>, %arg6: memref<1x16x64xf32, #tpu.memory_space<vmem>>) attributes {dimension_semantics = [#tpu.dimension_semantics<parallel>], iteration_bounds = array<i64: 2>, scalar_prefetch = 0 : i64, scratch_operands = 0 : i64, tpu.core_type = #tpu.core_type<tc>, window_params = [{transform_indices = @transform_0, window_bounds = array<i64: 1, 16, 64>}, {pipeline_mode = #tpu.pipeline_mode<synchronous>, transform_indices = @transform_1, window_bounds = array<i64: 192, 64>}, {pipeline_mode = #tpu.pipeline_mode<synchronous>, transform_indices = @transform_2, window_bounds = array<i64: 1, 64>}, {pipeline_mode = #tpu.pipeline_mode<synchronous>, transform_indices = @transform_3, window_bounds = array<i64: 192, 64>}, {pipeline_mode = #tpu.pipeline_mode<synchronous>, transform_indices = @transform_4, window_bounds = array<i64: 1, 64>}, {transform_indices = @transform_5, window_bounds = array<i64: 1, 16, 64>}]} {
    %c0 = arith.constant 0 : index
    %c0_0 = arith.constant 0 : index
    %c0_1 = arith.constant 0 : index
    %0 = vector.load %arg1[%c0, %c0_0, %c0_1] : memref<1x16x64xf32, #tpu.memory_space<vmem>>, vector<1x16x64xf32>
    %1 = vector.shape_cast %0 : vector<1x16x64xf32> to vector<16x64xf32>
    %cst = arith.constant 0.000000e+00 : f32
    %2 = vector.broadcast %cst : f32 to vector<1x64xf32>
    %3 = vector.extract_strided_slice %1 {offsets = [0, 0], sizes = [15, 64], strides = [1, 1]} : vector<16x64xf32> to vector<15x64xf32>
    %4 = tpu.concatenate %2, %3 in 0 : vector<1x64xf32>, vector<15x64xf32> -> vector<16x64xf32>
    %5 = vector.extract_strided_slice %1 {offsets = [1, 0], sizes = [15, 64], strides = [1, 1]} : vector<16x64xf32> to vector<15x64xf32>
    %6 = tpu.concatenate %5, %2 in 0 : vector<15x64xf32>, vector<1x64xf32> -> vector<16x64xf32>
    %7 = tpu.concatenate %4, %1, %6 in 1 : vector<16x64xf32>, vector<16x64xf32>, vector<16x64xf32> -> vector<16x192xf32>
    %8 = arith.truncf %7 : vector<16x192xf32> to vector<16x192xbf16>
    %c0_2 = arith.constant 0 : index
    %c0_3 = arith.constant 0 : index
    %9 = vector.load %arg2[%c0_2, %c0_3] : memref<192x64xbf16, #tpu.memory_space<vmem>>, vector<192x64xbf16>
    %cst_4 = arith.constant dense<0.000000e+00> : vector<16x64xf32>
    %10 = tpu.matmul %8, %9, %cst_4 {dimension_numbers = #tpu.dot_dimension_numbers<[1], [0], [0], [1], [0, 0, 1, 1], [], []>} : vector<16x192xbf16>, vector<192x64xbf16>, vector<16x64xf32> -> vector<16x64xf32>
    %c0_5 = arith.constant 0 : index
    %c0_6 = arith.constant 0 : index
    %11 = vector.load %arg3[%c0_5, %c0_6] : memref<1x64xf32, #tpu.memory_space<vmem>>, vector<1x64xf32>
    %12 = vector.broadcast %11 : vector<1x64xf32> to vector<16x64xf32>
    %13 = arith.addf %10, %12 : vector<16x64xf32>
    %cst_7 = arith.constant 0.000000e+00 : f32
    %14 = vector.broadcast %cst_7 : f32 to vector<16x64xf32>
    %15 = arith.maximumf %13, %14 : vector<16x64xf32>
    %cst_8 = arith.constant 0.000000e+00 : f32
    %16 = vector.broadcast %cst_8 : f32 to vector<1x64xf32>
    %17 = vector.extract_strided_slice %15 {offsets = [0, 0], sizes = [15, 64], strides = [1, 1]} : vector<16x64xf32> to vector<15x64xf32>
    %18 = tpu.concatenate %16, %17 in 0 : vector<1x64xf32>, vector<15x64xf32> -> vector<16x64xf32>
    %19 = vector.extract_strided_slice %15 {offsets = [1, 0], sizes = [15, 64], strides = [1, 1]} : vector<16x64xf32> to vector<15x64xf32>
    %20 = tpu.concatenate %19, %16 in 0 : vector<15x64xf32>, vector<1x64xf32> -> vector<16x64xf32>
    %21 = tpu.concatenate %18, %15, %20 in 1 : vector<16x64xf32>, vector<16x64xf32>, vector<16x64xf32> -> vector<16x192xf32>
    %22 = arith.truncf %21 : vector<16x192xf32> to vector<16x192xbf16>
    %c0_9 = arith.constant 0 : index
    %c0_10 = arith.constant 0 : index
    %23 = vector.load %arg4[%c0_9, %c0_10] : memref<192x64xbf16, #tpu.memory_space<vmem>>, vector<192x64xbf16>
    %cst_11 = arith.constant dense<0.000000e+00> : vector<16x64xf32>
    %24 = tpu.matmul %22, %23, %cst_11 {dimension_numbers = #tpu.dot_dimension_numbers<[1], [0], [0], [1], [0, 0, 1, 1], [], []>} : vector<16x192xbf16>, vector<192x64xbf16>, vector<16x64xf32> -> vector<16x64xf32>
    %c0_12 = arith.constant 0 : index
    %c0_13 = arith.constant 0 : index
    %25 = vector.load %arg5[%c0_12, %c0_13] : memref<1x64xf32, #tpu.memory_space<vmem>>, vector<1x64xf32>
    %26 = vector.broadcast %25 : vector<1x64xf32> to vector<16x64xf32>
    %27 = arith.addf %24, %26 : vector<16x64xf32>
    %28 = arith.addf %27, %1 : vector<16x64xf32>
    %cst_14 = arith.constant 0.000000e+00 : f32
    %29 = vector.broadcast %cst_14 : f32 to vector<16x64xf32>
    %30 = arith.maximumf %28, %29 : vector<16x64xf32>
    %c0_15 = arith.constant 0 : index
    %c0_16 = arith.constant 0 : index
    %c0_17 = arith.constant 0 : index
    %31 = vector.load %arg6[%c0_15, %c0_16, %c0_17] : memref<1x16x64xf32, #tpu.memory_space<vmem>>, vector<1x16x64xf32>
    %32 = vector.shape_cast %31 : vector<1x16x64xf32> to vector<16x64xf32>
    %33 = vector.shape_cast %30 : vector<16x64xf32> to vector<1x16x64xf32>
    tpu.vector_store %arg6[%c0_15, %c0_16, %c0_17], %33 {strides = array<i32>} : memref<1x16x64xf32, #tpu.memory_space<vmem>>, vector<1x16x64xf32>,
    return
  }
  func.func @transform_0(%arg0: i32) -> (i32, i32, i32) {
    %c0_i32 = arith.constant 0 : i32
    %c0_i32_0 = arith.constant 0 : i32
    %c0_i32_1 = arith.constant 0 : i32
    return %arg0, %c0_i32, %c0_i32_0 : i32, i32, i32
  }
  func.func @transform_1(%arg0: i32) -> (i32, i32) {
    %c0_i32 = arith.constant 0 : i32
    %c0_i32_0 = arith.constant 0 : i32
    %c0_i32_1 = arith.constant 0 : i32
    return %c0_i32, %c0_i32_0 : i32, i32
  }
  func.func @transform_2(%arg0: i32) -> (i32, i32) {
    %c0_i32 = arith.constant 0 : i32
    %c0_i32_0 = arith.constant 0 : i32
    %c0_i32_1 = arith.constant 0 : i32
    return %c0_i32, %c0_i32_0 : i32, i32
  }
  func.func @transform_3(%arg0: i32) -> (i32, i32) {
    %c0_i32 = arith.constant 0 : i32
    %c0_i32_0 = arith.constant 0 : i32
    %c0_i32_1 = arith.constant 0 : i32
    return %c0_i32, %c0_i32_0 : i32, i32
  }
  func.func @transform_4(%arg0: i32) -> (i32, i32) {
    %c0_i32 = arith.constant 0 : i32
    %c0_i32_0 = arith.constant 0 : i32
    %c0_i32_1 = arith.constant 0 : i32
    return %c0_i32, %c0_i32_0 : i32, i32
  }
  func.func @transform_5(%arg0: i32) -> (i32, i32, i32) {
    %c0_i32 = arith.constant 0 : i32
    %c0_i32_0 = arith.constant 0 : i32
    %c0_i32_1 = arith.constant 0 : i32
    return %arg0, %c0_i32, %c0_i32_0 : i32, i32, i32
  }
}

</mosaic_0001>

<bundles_post_ra>
// kernel: tile.10
= control target key start
LH: loop header
LB: loop body
LE: loop exit
PB: predicated region body
PF: predicated region fallthrough
CT: control target
= control target key end

     0   :  { %s28_s0 = inlined_call_operand.vmem [shape: f32[4], index: 0, kind: input, shape index: {}]   ;;  %s29_s1 = inlined_call_operand.vmem [shape: f32[16,4], index: 1, kind: output, shape index: {}]  }
   0x1   :  { %v4_v0 = vld [vmem:[%s28_s0] ss:$0 sm:$0xff] }
   0x2   :  { %5 = vst [vmem:[%s29_s1] sm:$0xff] %v4_v0  ;;  %8 = vst [vmem:[%s29_s1 + $0x8] sm:$0xff] %v4_v0 }

// kernel: tile.11
= control target key start
LH: loop header
LB: loop body
LE: loop exit
PB: predicated region body
PF: predicated region fallthrough
CT: control target
= control target key end

     0   :  { %s131_s10 = smov 60   ;;  %s132_s11 = smov 52   ;;  %vm3_vm0 = vcmask 31744   ;;  %vm9_vm1 = vcmask 523744   ;;  %vm15_vm2 = vcmask 490944   ;;  %vm21_vm3 = vcmask 458144   ;;  %s207_s0 = inlined_call_operand.vmem [shape: f32[16,4], index: 0, kind: input, shape index: {}]   ;;  %s208_s1 = inlined_call_operand.vmem [shape: f32[1,64], index: 1, kind: output, shape index: {}]  }
   0x1   :  { %v101_v0 = vld [vmem:[%s207_s0 + $0xf] sm:$0x1]   ;;  %v103_v1 = vld [vmem:[%s207_s0 + $0xd] sm:$0x1]   ;;  %v102_v2 = vld [vmem:[%s207_s0 + $0xe] sm:$0x1]  }
   0x2   :  { %7 = vrot.lane.b32.xlu0 %v101_v0, %s131_s10  ;;  %19 = vrot.lane.b32.xlu1 %v103_v1, %s132_s11  ;;  %v104_v3 = vld [vmem:[%s207_s0 + $0xc] sm:$0x1]   ;;  %s133_s16 = smov 56   ;;  %s134_s17 = smov 48   ;;  %v105_v4 = vld [vmem:[%s207_s0 + $0xb] sm:$0x1]  }
   0x3   :  { %v106_v5 = vld [vmem:[%s207_s0 + $0xa] sm:$0x1]   ;;  %v2_v6 = vld [vmem:[%s207_s0] sm:$0x1]   ;;  %s135_s24 = smov 44   ;;  %s136_s25 = smov 40  }
   0x4   :  { %4 = vst.msk [vmem:[#allocation0] sm:$0x1] %vm3_vm0, %v2_v6   ;;  %v107_v7 = vld [vmem:[%s207_s0 + $0x9] sm:$0x1]   ;;  %v108_v8 = vld [vmem:[%s207_s0 + $0x8] sm:$0x1]  }
   0x5   :  { %s137_s30 = smov 36   ;;  %s138_s2 = smov 32   ;;  %v109_v9 = vld [vmem:[%s207_s0 + $0x7] sm:$0x1]   ;;  %v110_v10 = vld [vmem:[%s207_s0 + $0x6] sm:$0x1]  }
   0x6   :  { %13 = vrot.lane.b32.xlu0 %v102_v2, %s133_s16  ;;  %25 = vrot.lane.b32.xlu1 %v104_v3, %s134_s17  ;;  %s139_s7 = smov 28   ;;  %s140_s8 = smov 24   ;;  %v111_v11 = vld [vmem:[%s207_s0 + $0x5] sm:$0x1]   ;;  %v112_v12 = vld [vmem:[%s207_s0 + $0x4] sm:$0x1]  }
   0x7   :  { %s141_s13 = smov 20   ;;  %s142_s14 = smov 16   ;;  %v113_v13 = vld [vmem:[%s207_s0 + $0x3] sm:$0x1]   ;;  %v114_v14 = vld [vmem:[%s207_s0 + $0x2] sm:$0x1]  }
   0x8   :  { %s143_s19 = smov 12   ;;  %s144_s20 = smov 8   ;;  %v115_v15 = vld [vmem:[%s207_s0 + $0x1] sm:$0x1]   ;;  %vm27_vm4 = vcmask 425344   ;;  %vm33_vm5 = vcmask 392544  }
   0x9   :  { %s145_s0 = smov 4   ;;  %vm39_vm6 = vcmask 359744   ;;  %vm45_vm7 = vcmask 326944   ;;  %vm51_vm8 = vcmask 294144   ;;  %vm57_vm9 = vcmask 261344  }
   0xa   :  { %31 = vrot.lane.b32.xlu0 %v105_v4, %s135_s24  ;;  %37 = vrot.lane.b32.xlu1 %v106_v5, %s136_s25  ;;  %vm63_vm10 = vcmask 228544   ;;  %vm69_vm11 = vcmask 195744   ;;  %vm75_vm12 = vcmask 162944   ;;  %vm81_vm13 = vcmask 130144  }
   0xb   :  { %vm87_vm14 = vcmask 97344   ;;  %vm93_vm15 = vcmask 64544  }
   0xe   :  { %43 = vrot.lane.b32.xlu0 %v107_v7, %s137_s30  ;;  %49 = vrot.lane.b32.xlu1 %v108_v8, %s138_s2 }
  0x12   :  { %55 = vrot.lane.b32.xlu0 %v109_v9, %s139_s7  ;;  %61 = vrot.lane.b32.xlu1 %v110_v10, %s140_s8 }
  0x16   :  { %67 = vrot.lane.b32.xlu0 %v111_v11, %s141_s13  ;;  %73 = vrot.lane.b32.xlu1 %v112_v12, %s142_s14 }
  0x1a   :  { %79 = vrot.lane.b32.xlu0 %v113_v13, %s143_s19  ;;  %85 = vrot.lane.b32.xlu1 %v114_v14, %s144_s20 }
  0x1e   :  { %91 = vrot.lane.b32.xlu0 %v115_v15, %s145_s0 }
  0x74   :  { %v8_v16 = vpop.permute.xlu0 %7   ;;  %v20_v17 = vpop.permute.xlu1 %19  }
  0x75   :  { %10 = vst.msk [vmem:[#allocation0] sm:$0x1] %vm9_vm1, %v8_v16  }
  0x78   :  { %v14_v18 = vpop.permute.xlu0 %13   ;;  %v26_v19 = vpop.permute.xlu1 %25  }
  0x79   :  { %16 = vst.msk [vmem:[#allocation0] sm:$0x1] %vm15_vm2, %v14_v18  }
  0x7a   :  { %22 = vst.msk [vmem:[#allocation0] sm:$0x1] %vm21_vm3, %v20_v17  }
  0x7b   :  { %28 = vst.msk [vmem:[#allocation0] sm:$0x1] %vm27_vm4, %v26_v19  }
  0x7c   :  { %v32_v20 = vpop.permute.xlu0 %31   ;;  %v38_v21 = vpop.permute.xlu1 %37  }
  0x7d   :  { %34 = vst.msk [vmem:[#allocation0] sm:$0x1] %vm33_vm5, %v32_v20  }
  0x7e   :  { %40 = vst.msk [vmem:[#allocation0] sm:$0x1] %vm39_vm6, %v38_v21  }
  0x80   :  { %v44_v22 = vpop.permute.xlu0 %43   ;;  %v50_v23 = vpop.permute.xlu1 %49  }
  0x81   :  { %46 = vst.msk [vmem:[#allocation0] sm:$0x1] %vm45_vm7, %v44_v22  }
  0x82   :  { %52 = vst.msk [vmem:[#allocation0] sm:$0x1] %vm51_vm8, %v50_v23  }
  0x84   :  { %v56_v24 = vpop.permute.xlu0 %55   ;;  %v62_v25 = vpop.permute.xlu1 %61  }
  0x85   :  { %58 = vst.msk [vmem:[#allocation0] sm:$0x1] %vm57_vm9, %v56_v24  }
  0x86   :  { %64 = vst.msk [vmem:[#allocation0] sm:$0x1] %vm63_vm10, %v62_v25  }
  0x88   :  { %v68_v26 = vpop.permute.xlu0 %67   ;;  %v74_v27 = vpop.permute.xlu1 %73  }
  0x89   :  { %70 = vst.msk [vmem:[#allocation0] sm:$0x1] %vm69_vm11, %v68_v26  }
  0x8a   :  { %76 = vst.msk [vmem:[#allocation0] sm:$0x1] %vm75_vm12, %v74_v27  }
  0x8c   :  { %v80_v28 = vpop.permute.xlu0 %79   ;;  %v86_v29 = vpop.permute.xlu1 %85  }
  0x8d   :  { %82 = vst.msk [vmem:[#allocation0] sm:$0x1] %vm81_vm13, %v80_v28  }
  0x8e   :  { %88 = vst.msk [vmem:[#allocation0] sm:$0x1] %vm87_vm14, %v86_v29  }
  0x90   :  { %v92_v30 = vpop.permute.xlu0 %91  }
  0x91   :  { %94 = vst.msk [vmem:[#allocation0] sm:$0x1] %vm93_vm15, %v92_v30  }
  0x98   :  { %v98_v31 = vld [vmem:[#allocation0] sm:$0x1] }
  0x99   :  { %100 = vst [vmem:[%s208_s1] sm:$0x1] %v98_v31 }

// kernel: basic_block_forward.1
= control target key start
LH: loop header
LB: loop body
LE: loop exit
PB: predicated region body
PF: predicated region fallthrough
CT: control target
= control target key end

     0   :  { %s761_s18 = smov 0   ;;  %s917_s0 = inlined_call_operand.vmem [shape: f32[2,16,64], index: 0, kind: input, shape index: {}]   ;;  %s918_s1 = inlined_call_operand.vmem [shape: bf16[192,64], index: 1, kind: input, shape index: {}]   ;;  %s919_s2 = inlined_call_operand.vmem [shape: f32[1,64], index: 2, kind: input, shape index: {}]   ;;  %s920_s3 = inlined_call_operand.vmem [shape: bf16[192,64], index: 3, kind: input, shape index: {}]   ;;  %s921_s4 = inlined_call_operand.vmem [shape: f32[1,64], index: 4, kind: input, shape index: {}]   ;;  %s922_s5 = inlined_call_operand.vmem [shape: f32[2,16,64], index: 5, kind: output, shape index: {}]  }
   0x1 LB: > { %s636_s19 = sadd.s32 4294967295, %s727_s18   ;;  %p640_p0 = scmp.ge.s32.totalorder %s727_s18, 1  ;;  %s727_s18 = sphi %s761_s18, %s15_s18  }
   0x2   : > { %p187_p1 = scmp.lt.s32.totalorder %s727_s18, 3 }
   0x4   : > { %p188_p2 = pnand %p640_p0, %p187_p1 }
   0x5   : > { %p215_p3 = scmp.lt.s32.totalorder (!%p188_p2), %s636_s19, 1  ;;  %v697_v0 = vld [vmem:[%s918_s1] sm:$0xff] (!%p188_p2)   ;;  %v729_v1 = vmov (!%p188_p2), 0   ;;  %v698_v2 = vld [vmem:[%s918_s1 + $0x8] sm:$0xff] (!%p188_p2)   ;;  %v699_v5 = vld [vmem:[%s918_s1 + $0x10] sm:$0xff] (!%p188_p2)   ;;  %vm237_vm0 = vcmask (!%p188_p2), 1046528  }
   0x6   : > { %191 = sbr.rel (%p188_p2) target bundleno = 700 (0x2bc), region = 40  ;;  %361 = vmatprep.subr.bf16.mxu0 (!%p188_p2), %v729_v1  ;;  %534 = vmatprep.subr.bf16.mxu1 (!%p188_p2), %v729_v1  ;;  %s730_s30 = smov (!%p188_p2), 64   ;;  %v700_v9 = vld [vmem:[%s918_s1 + $0x18] sm:$0xff] (!%p188_p2)   ;;  %v701_v13 = vld [vmem:[%s918_s1 + $0x20] sm:$0xff] (!%p188_p2)   ;;  %vm250_vm1 = vcmask (!%p188_p2), 523264   ;;  %v702_v14 = vld [vmem:[%s918_s1 + $0x28] sm:$0xff] (!%p188_p2)  }
   0x7   : > { %362 = vmatpush1.bf16.msra.mxu0 (!%p188_p2), %v697_v0  ;;  %v703_v15 = vld [vmem:[%s918_s1 + $0x30] sm:$0xff] (!%p188_p2)   ;;  %v704_v16 = vld [vmem:[%s918_s1 + $0x38] sm:$0xff] (!%p188_p2)   ;;  %v705_v17 = vld [vmem:[%s918_s1 + $0x40] sm:$0xff] (!%p188_p2)   ;;  %vm230_vm2 = vcmask (!%p188_p2), 1040384  }
   0x8   : > { %363 = vmatprep.subr.bf16.mxu0 (!%p188_p2), %v729_v1  ;;  %v706_v18 = vld [vmem:[%s918_s1 + $0x48] sm:$0xff] (!%p188_p2)   ;;  %v707_v19 = vld [vmem:[%s918_s1 + $0x50] sm:$0xff] (!%p188_p2)   ;;  %v708_v20 = vld [vmem:[%s918_s1 + $0x58] sm:$0xff] (!%p188_p2)  }
   0x9   : > { %v709_v31 = vld [vmem:[%s920_s3] sm:$0xff] (!%p188_p2)   ;;  %v710_v32 = vld [vmem:[%s920_s3 + $0x8] sm:$0xff] (!%p188_p2)   ;;  %v711_v33 = vld [vmem:[%s920_s3 + $0x10] sm:$0xff] (!%p188_p2)  }
   0xa   : > { %535 = vmatpush1.bf16.msra.mxu1 (!%p188_p2), %v709_v31  ;;  %v712_v34 = vld [vmem:[%s920_s3 + $0x18] sm:$0xff] (!%p188_p2)   ;;  %v713_v35 = vld [vmem:[%s920_s3 + $0x20] sm:$0xff] (!%p188_p2)   ;;  %v714_v36 = vld [vmem:[%s920_s3 + $0x28] sm:$0xff] (!%p188_p2)  }
   0xb   : > { %364 = vmatpush1.bf16.msra.mxu0 (!%p188_p2), %v698_v2  ;;  %536 = vmatprep.subr.bf16.mxu1 (!%p188_p2), %v729_v1  ;;  %v715_v37 = vld [vmem:[%s920_s3 + $0x30] sm:$0xff] (!%p188_p2)   ;;  %v716_v38 = vld [vmem:[%s920_s3 + $0x38] sm:$0xff] (!%p188_p2)   ;;  %v717_v39 = vld [vmem:[%s920_s3 + $0x40] sm:$0xff] (!%p188_p2)  }
   0xc   : > { %365 = vmatprep.subr.bf16.mxu0 (!%p188_p2), %v729_v1  ;;  %v718_v40 = vld [vmem:[%s920_s3 + $0x48] sm:$0xff] (!%p188_p2)   ;;  %v719_v41 = vld [vmem:[%s920_s3 + $0x50] sm:$0xff] (!%p188_p2)   ;;  %v720_v42 = vld [vmem:[%s920_s3 + $0x58] sm:$0xff] (!%p188_p2)  }
   0xd   : > { %s924_s19 = smov (!%p215_p3, %s636_s19), 1  ;;  %v645_v43 = vld [vmem:[%s919_s2] ss:$0 sm:$0xff] }
   0xe   : > { %s675_s24 = sshll.u32 %s924_s19, 4  ;;  %537 = vmatpush1.bf16.msra.mxu1 %v710_v32 }
   0xf   : > { %s219_s27 = scalar_lea.vmem %s917_s0, %s675_s24  ;;  %366 = vmatpush1.bf16.msra.mxu0 %v699_v5  ;;  %538 = vmatprep.subr.bf16.mxu1 %v729_v1  ;;  %s224_s11 = scalar_lea.vmem %s922_s5, %s675_s24 }
  0x10   : > { %v786_v3 = vld [vmem:[%s219_s27] sm:$0xff]  ;;  %v788_v4 = vld [vmem:[%s219_s27 + $0x8] sm:$0xff]  ;;  %367 = vmatprep.subr.bf16.mxu0 %v729_v1 }
  0x11   : > { %v687_v6 = vpack.i.bf16 %v788_v4, %v786_v3  ;;  %v238_v7 = vrot.slane %v786_v3, 1  ;;  %v239_v8 = vrot.slane %v788_v4, 1  ;;  %v232_v21 = vrot.slane %v788_v4, 7 }
  0x12   : > { %v231_v22 = vrot.slane %v786_v3, 7  ;;  %539 = vmatpush1.bf16.msra.mxu1 %v711_v33 }
  0x13   : > { %688 = vrot.lane.b32.xlu0 %v687_v6, %s730_s30  ;;  %v240_v10 = vsel %vm237_vm0, %v238_v7, %v239_v8  ;;  %v243_v11 = vsel %vm237_vm0, %v239_v8, 0.0  ;;  %368 = vmatpush1.bf16.msra.mxu0 %v700_v9  ;;  %v659_v6 = vld [vmem:[%s921_s4] ss:$0 sm:$0xff] }
  0x14   : > { %v254_v12 = vpack.c.bf16 %v243_v11, %v240_v10  ;;  %369 = vmatprep.subr.bf16.mxu0 %v729_v1  ;;  %v233_v24 = vsel %vm230_vm2, %v231_v22, %v232_v21  ;;  %v236_v25 = vsel %vm230_vm2, 0.0, %v231_v22  ;;  %540 = vmatprep.subr.bf16.mxu1 %v729_v1 }
  0x16   : > { %658 = vmatprep.mubr.msk.bf16.mxu0 %vm250_vm1, %v254_v12  ;;  %541 = vmatpush1.bf16.msra.mxu1 %v712_v34 }
  0x17   : > { %370 = vmatpush1.bf16.msra.mxu0 %v701_v13  ;;  %542 = vmatprep.subr.bf16.mxu1 %v729_v1 }
  0x18   : > { %371 = vmatprep.subr.bf16.mxu0 %v729_v1 }
  0x1a   : > { %543 = vmatpush1.bf16.msra.mxu1 %v713_v35 }
  0x1b   : > { %372 = vmatpush1.bf16.msra.mxu0 %v702_v14  ;;  %544 = vmatprep.subr.bf16.mxu1 %v729_v1 }
  0x1c   : > { %373 = vmatprep.subr.bf16.mxu0 %v729_v1 }
  0x1e   : > { %545 = vmatpush1.bf16.msra.mxu1 %v714_v36 }
  0x1f   : > { %374 = vmatpush1.bf16.msra.mxu0 %v703_v15  ;;  %546 = vmatprep.subr.bf16.mxu1 %v729_v1 }
  0x20   : > { %375 = vmatprep.subr.bf16.mxu0 %v729_v1 }
  0x22   : > { %547 = vmatpush1.bf16.msra.mxu1 %v715_v37 }
  0x23   : > { %376 = vmatpush1.bf16.msra.mxu0 %v704_v16  ;;  %548 = vmatprep.subr.bf16.mxu1 %v729_v1 }
  0x24   : > { %377 = vmatprep.subr.bf16.mxu0 %v729_v1 }
  0x26   : > { %549 = vmatpush1.bf16.msra.mxu1 %v716_v38 }
  0x27   : > { %378 = vmatpush1.bf16.msra.mxu0 %v705_v17  ;;  %550 = vmatprep.subr.bf16.mxu1 %v729_v1 }
  0x28   : > { %379 = vmatprep.subr.bf16.mxu0 %v729_v1 }
  0x2a   : > { %551 = vmatpush1.bf16.msra.mxu1 %v717_v39 }
  0x2b   : > { %380 = vmatpush1.bf16.msra.mxu0 %v706_v18  ;;  %552 = vmatprep.subr.bf16.mxu1 %v729_v1 }
  0x2c   : > { %381 = vmatprep.subr.bf16.mxu0 %v729_v1 }
  0x2e   : > { %553 = vmatpush1.bf16.msra.mxu1 %v718_v40 }
  0x2f   : > { %382 = vmatpush1.bf16.msra.mxu0 %v707_v19  ;;  %554 = vmatprep.subr.bf16.mxu1 %v729_v1 }
  0x30   : > { %383 = vmatprep.subr.bf16.mxu0 %v729_v1 }
  0x32   : > { %555 = vmatpush1.bf16.msra.mxu1 %v719_v41 }
  0x33   : > { %384 = vmatpush1.bf16.msra.mxu0 %v708_v20  ;;  %556 = vmatprep.subr.bf16.mxu1 %v729_v1 }
  0x36   : > { %557 = vmatpush1.bf16.msra.mxu1 %v720_v42 }
  0x85   : > { %v689_v23 = vpop.permute.xlu0 %688 }
  0x86   : > { %v691_v26 = vunpack.i.h.bf16 %v689_v23  ;;  %v690_v27 = vunpack.i.l.bf16 %v689_v23 }
  0x88   : > { %v251_v28 = vsel %vm250_vm1, %v236_v25, %v690_v27  ;;  %v252_v29 = vsel %vm250_vm1, %v233_v24, %v691_v26 }
  0x89   : > { %v253_v30 = vpack.c.bf16 %v252_v29, %v251_v28 }
  0x8b   : > { %394 = vmatmul.mubr.bf16.vlgmr.msra.gmra.mrb[0].mxu0 %v253_v30 }
 0x15e   : > { %v395_v44 = vpop.f32.mrb[0].mxu0 }
 0x15f   : > { %v396_v45 = vadd.f32 %v645_v43, %v395_v44  ;;  %v397_v46 = vpop.f32.mrb[1].mxu0 }
 0x160   : > { %v398_v47 = vpop.f32.mrb[2].mxu0 }
 0x161   : > { %v402_v48 = vmax.f32 %v396_v45, 0.0  ;;  %v399_v49 = vadd.f32 %v645_v43, %v398_v47  ;;  %v400_v50 = vpop.f32.mrb[3].mxu0 }
 0x163   : > { %v403_v51 = vmax.f32 %v399_v49, 0.0  ;;  %v406_v52 = vrot.slane %v402_v48, 7  ;;  %v412_v53 = vrot.slane %v402_v48, 1 }
 0x165   : > { %v407_v54 = vrot.slane %v403_v51, 7  ;;  %v692_v55 = vpack.i.bf16 %v403_v51, %v402_v48  ;;  %v413_v56 = vrot.slane %v403_v51, 1  ;;  %v411_v0 = vsel %vm230_vm2, 0.0, %v406_v52 }
 0x167   : > { %693 = vrot.lane.b32.xlu0 %v692_v55, %s730_s30  ;;  %v414_v57 = vsel %vm237_vm0, %v412_v53, %v413_v56  ;;  %v417_v58 = vsel %vm237_vm0, %v413_v56, 0.0  ;;  %v408_v59 = vsel %vm230_vm2, %v406_v52, %v407_v54 }
 0x168   : > { %v427_v60 = vpack.c.bf16 %v417_v58, %v414_v57 }
 0x16a   : > { %672 = vmatprep.mubr.msk.bf16.mxu1 %vm250_vm1, %v427_v60 }
 0x1d9   : > { %v694_v61 = vpop.permute.xlu0 %693 }
 0x1da   : > { %v696_v62 = vunpack.i.h.bf16 %v694_v61  ;;  %v695_v63 = vunpack.i.l.bf16 %v694_v61 }
 0x1dc   : > { %v424_v1 = vsel %vm250_vm1, %v411_v0, %v695_v63  ;;  %v425_v2 = vsel %vm250_vm1, %v408_v59, %v696_v62 }
 0x1dd   : > { %v426_v5 = vpack.c.bf16 %v425_v2, %v424_v1 }
 0x1df   : > { %567 = vmatmul.mubr.bf16.vlgmr.msra.gmra.mrb[0].mxu1 %v426_v5 }
 0x2b2   : > { %v568_v7 = vpop.f32.mrb[0].mxu1 }
 0x2b3   : > { %v569_v8 = vadd.f32 %v659_v6, %v568_v7  ;;  %v570_v9 = vpop.f32.mrb[1].mxu1 }
 0x2b4   : > { %v571_v10 = vpop.f32.mrb[2].mxu1 }
 0x2b5   : > { %v575_v11 = vadd.f32 %v569_v8, %v786_v3  ;;  %v572_v12 = vadd.f32 %v659_v6, %v571_v10  ;;  %v573_v13 = vpop.f32.mrb[3].mxu1 }
 0x2b7   : > { %v577_v14 = vmax.f32 %v575_v11, 0.0  ;;  %v576_v15 = vadd.f32 %v572_v12, %v788_v4 }
 0x2b9   : > { %579 = vst.msk [vmem:[%s224_s11] sm:$0xff] %vm250_vm1, %v577_v14  ;;  %v578_v16 = vmax.f32 %v576_v15, 0.0 }
 0x2bb   : > { %580 = vst.msk [vmem:[%s224_s11 + $0x8] sm:$0xff] %vm250_vm1, %v578_v16 }
 0x2bc PF: > { %s15_s18 = sadd.s32 1, %s727_s18  }
 0x2bd   : > { %p12_p4 = scmp.ge.s32.totalorder %s15_s18, 4  }
 0x2bf   :  { %14 = sbr.rel (!%p12_p4) target bundleno = 1 (0x1), region = 70 }

</bundles_post_ra>
